<compile_context>
chip_gen: v6e
topology: v6e:2x2x1
jax: 0.10.0
libtpu: 0.0.40
codegen_flags: <defaults>
</compile_context>

<pallas_src>
import functools

import jax
import jax.numpy as jnp
from jax import lax
from jax.experimental import pallas as pl
from jax.experimental.pallas import tpu as pltpu

_LANE = 128


def _round_up(x, m):
    return ((x + m - 1) // m) * m


# ----------------------------------------------------------------------------
# Kernels
# ----------------------------------------------------------------------------
def _odenet_fwd_kernel(inp_ref, t_ref, hid_ref,
                       w1x_ref, w1t_ref, w1h_ref, b1_ref, w2_ref, b2_ref,
                       o_ref):
    # inp_ref: [tb, F]   t_ref: [tb, 1]   hid_ref: [tb, Dp]   (Dp = padded hidden)
    # w1x: [F, Hp]  w1t: [1, Hp]  w1h: [Dp, Hp]  b1: [1, Hp]
    # w2 : [Hp, Dp] b2 : [1, Dp]   o_ref: [tb, Dp]
    pre = (jnp.dot(inp_ref[...], w1x_ref[...], preferred_element_type=jnp.float32)
           + t_ref[...] * w1t_ref[...]          # rank-1 term: VPU broadcast, no MXU pass
           + jnp.dot(hid_ref[...], w1h_ref[...], preferred_element_type=jnp.float32)
           + b1_ref[...])
    z = jnp.tanh(pre)
    y = jnp.dot(z, w2_ref[...], preferred_element_type=jnp.float32) + b2_ref[...]
    o_ref[...] = jnp.tanh(y).astype(o_ref.dtype)


def _odenet_euler_kernel(inp_ref, t0_ref, dt_ref, h0_ref,
                         w1x_ref, w1t_ref, w1h_ref, b1_ref, w2_ref, b2_ref,
                         o_ref, *, num_steps):
    # Fused explicit-Euler solve: h_{k+1} = h_k + dt * net(inp, t_k, h_k),
    # t_{k+1} = t_k + dt.  Weights stay VMEM-resident across all steps; the
    # inp@W1x + b1 term is constant over the solve and hoisted out of the loop.
    w1t = w1t_ref[...]
    w1h = w1h_ref[...]
    w2 = w2_ref[...]
    b2 = b2_ref[...]
    xw = jnp.dot(inp_ref[...], w1x_ref[...],
                 preferred_element_type=jnp.float32) + b1_ref[...]
    dt = dt_ref[...].astype(jnp.float32)

    def body(_, carry):
        t, h = carry
        z = jnp.tanh(xw + t * w1t
                     + jnp.dot(h, w1h, preferred_element_type=jnp.float32))
        f = jnp.tanh(jnp.dot(z, w2, preferred_element_type=jnp.float32) + b2)
        return (t + dt, h + dt * f)

    t0 = t0_ref[...].astype(jnp.float32)
    h0 = h0_ref[...].astype(jnp.float32)
    _, h_final = lax.fori_loop(0, num_steps, body, (t0, h0))
    o_ref[...] = h_final.astype(o_ref.dtype)


# ----------------------------------------------------------------------------
# Parameter handling
# ----------------------------------------------------------------------------
def init_params(key, hidden_dim, feature_dim, dtype=jnp.float32):
    """Matches the PyTorch module: weights ~ N(0, 0.1), zero biases.
    Weights are stored [in, out] (transpose of torch's [out, in])."""
    d_in = hidden_dim + feature_dim + 1
    d_mid = max(d_in * 2, 60)
    k1, k2 = jax.random.split(key)
    w1 = 0.1 * jax.random.normal(k1, (d_in, d_mid), dtype=dtype)
    b1 = jnp.zeros((1, d_mid), dtype=dtype)
    w2 = 0.1 * jax.random.normal(k2, (d_mid, hidden_dim), dtype=dtype)
    b2 = jnp.zeros((1, hidden_dim), dtype=dtype)
    return (w1, b1, w2, b2)


def prepare_params(params, feature_dim, hidden_dim, lane=_LANE):
    """Split W1 into (input, t, hidden) row blocks and zero-pad everything to
    lane-dense (multiples of 128) widths.  Zero padding of W1 columns / b1 and
    of W2 rows+columns / b2 keeps the real output columns bit-equivalent."""
    w1, b1, w2, b2 = params
    d_in, d_mid = w1.shape
    assert d_in == feature_dim + 1 + hidden_dim
    hp = _round_up(d_mid, lane)       # padded inner width
    dp = _round_up(hidden_dim, lane)  # padded hidden/output width
    pad_h = hp - d_mid
    pad_d = dp - hidden_dim

    w1x = jnp.pad(w1[:feature_dim], ((0, 0), (0, pad_h)))
    w1t = jnp.pad(w1[feature_dim:feature_dim + 1], ((0, 0), (0, pad_h)))
    w1h = jnp.pad(w1[feature_dim + 1:], ((0, pad_d), (0, pad_h)))
    b1p = jnp.pad(b1.reshape(1, -1), ((0, 0), (0, pad_h)))
    w2p = jnp.pad(w2, ((0, pad_h), (0, pad_d)))
    b2p = jnp.pad(b2.reshape(1, -1), ((0, 0), (0, pad_d)))
    return (w1x, w1t, w1h, b1p, w2p, b2p)


# ----------------------------------------------------------------------------
# Wrappers
# ----------------------------------------------------------------------------
def _batch_tile(batch, batch_tile):
    if batch >= batch_tile and batch % batch_tile == 0:
        return batch_tile
    return batch


def _specs(tb, F, Hp, Dp):
    bspec = lambda cols: pl.BlockSpec((tb, cols), lambda i: (i, 0))
    wspec = lambda shape: pl.BlockSpec(shape, lambda i: (0, 0))  # VMEM-resident
    return bspec, wspec


def odenet_hit_forward(inp, t, dt, hidden, prepared, *, batch_tile=256):
    """Single forward step == ODENetHIT.forward.  `dt` accepted but unused."""
    del dt  # unused in the reference forward
    w1x, w1t, w1h, b1, w2, b2 = prepared
    B, F = inp.shape
    Hd = hidden.shape[1]
    Hp = w1x.shape[1]
    Dp = w2.shape[1]

    hid_p = hidden if Hd == Dp else jnp.pad(hidden, ((0, 0), (0, Dp - Hd)))
    tb = _batch_tile(B, batch_tile)
    bspec, wspec = _specs(tb, F, Hp, Dp)

    out = pl.pallas_call(
        _odenet_fwd_kernel,
        out_shape=jax.ShapeDtypeStruct((B, Dp), inp.dtype),
        grid=(B // tb,),
        in_specs=[
            bspec(F), bspec(1), bspec(Dp),
            wspec((F, Hp)), wspec((1, Hp)), wspec((Dp, Hp)),
            wspec((1, Hp)), wspec((Hp, Dp)), wspec((1, Dp)),
        ],
        out_specs=bspec(Dp),
        compiler_params=pltpu.CompilerParams(dimension_semantics=("parallel",)),
    )(inp, t, hid_p, w1x, w1t, w1h, b1, w2, b2)
    return out[:, :Hd]


def odenet_hit_integrate(inp, t0, dt, hidden, prepared, *, num_steps,
                         batch_tile=256):
    """N explicit-Euler steps of the ODE fused into a single pallas_call.
    Weights and the hidden state stay on-chip for the whole solve."""
    w1x, w1t, w1h, b1, w2, b2 = prepared
    B, F = inp.shape
    Hd = hidden.shape[1]
    Hp = w1x.shape[1]
    Dp = w2.shape[1]

    hid_p = hidden if Hd == Dp else jnp.pad(hidden, ((0, 0), (0, Dp - Hd)))
    tb = _batch_tile(B, batch_tile)
    bspec, wspec = _specs(tb, F, Hp, Dp)

    kernel = functools.partial(_odenet_euler_kernel, num_steps=num_steps)
    out = pl.pallas_call(
        kernel,
        out_shape=jax.ShapeDtypeStruct((B, Dp), inp.dtype),
        grid=(B // tb,),
        in_specs=[
            bspec(F), bspec(1), bspec(1), bspec(Dp),
            wspec((F, Hp)), wspec((1, Hp)), wspec((Dp, Hp)),
            wspec((1, Hp)), wspec((Hp, Dp)), wspec((1, Dp)),
        ],
        out_specs=bspec(Dp),
        compiler_params=pltpu.CompilerParams(dimension_semantics=("parallel",)),
    )(inp, t0, dt, hid_p, w1x, w1t, w1h, b1, w2, b2)
    return out[:, :Hd]


# ----------------------------------------------------------------------------
# Self-test
# ----------------------------------------------------------------------------
if __name__ == "__main__":
    hidden_dim = 32
    feature_dim = 4
    batch = 8
    num_steps = 16

    key = jax.random.PRNGKey(0)
    kp, ki, kt, kh = jax.random.split(key, 4)

    params = init_params(kp, hidden_dim, feature_dim)
    prepared = prepare_params(params, feature_dim, hidden_dim)

    inp = jax.random.normal(ki, (batch, feature_dim), dtype=jnp.float32)
    t = jax.random.normal(kt, (batch, 1), dtype=jnp.float32)
    dt = jnp.full((batch, 1), 0.1, dtype=jnp.float32)  # unused by forward
    hidden = jax.random.normal(kh, (batch, hidden_dim), dtype=jnp.float32)

    w1, b1, w2, b2 = params

    # --- 1) single forward step (exact semantics of ODENetHIT.forward) ---
    out = odenet_hit_forward(inp, t, dt, hidden, prepared)
    out = jax.block_until_ready(out)

    x = jnp.concatenate([inp, t, hidden], axis=1)
    ref = jnp.tanh(jnp.tanh(x @ w1 + b1) @ w2 + b2)
    assert out.shape == (batch, hidden_dim)
    assert jnp.allclose(out, ref, atol=2e-5, rtol=2e-5), \
        float(jnp.max(jnp.abs(out - ref)))

    # --- 2) fused N-step Euler solve (solver loop folded into one launch) ---
    h_final = odenet_hit_integrate(inp, t, dt, hidden, prepared,
                                   num_steps=num_steps)
    h_final = jax.block_until_ready(h_final)

    h_r, t_r = hidden, t
    for _ in range(num_steps):
        x_r = jnp.concatenate([inp, t_r, h_r], axis=1)
        f_r = jnp.tanh(jnp.tanh(x_r @ w1 + b1) @ w2 + b2)
        h_r = h_r + dt * f_r
        t_r = t_r + dt
    assert h_final.shape == (batch, hidden_dim)
    assert jnp.allclose(h_final, h_r, atol=1e-4, rtol=1e-4), \
        float(jnp.max(jnp.abs(h_final - h_r)))

    print("KERNEL_OK")
</pallas_src>

<mosaic_0001>
module attributes {stable_mosaic.version = 11 : i64} {
  func.func @_odenet_fwd_kernel(%arg0: i32, %arg1: memref<8x4xf32, #tpu.memory_space<vmem>>, %arg2: memref<8x1xf32, #tpu.memory_space<vmem>>, %arg3: memref<8x128xf32, #tpu.memory_space<vmem>>, %arg4: memref<4x128xf32, #tpu.memory_space<vmem>>, %arg5: memref<1x128xf32, #tpu.memory_space<vmem>>, %arg6: memref<128x128xf32, #tpu.memory_space<vmem>>, %arg7: memref<1x128xf32, #tpu.memory_space<vmem>>, %arg8: memref<128x128xf32, #tpu.memory_space<vmem>>, %arg9: memref<1x128xf32, #tpu.memory_space<vmem>>, %arg10: memref<8x128xf32, #tpu.memory_space<vmem>>) attributes {dimension_semantics = [#tpu.dimension_semantics<parallel>], iteration_bounds = array<i64: 1>, scalar_prefetch = 0 : i64, scratch_operands = 0 : i64, tpu.core_type = #tpu.core_type<tc>, window_params = [{transform_indices = @transform_0, window_bounds = array<i64: 8, 4>}, {transform_indices = @transform_1, window_bounds = array<i64: 8, 1>}, {transform_indices = @transform_2, window_bounds = array<i64: 8, 128>}, {pipeline_mode = #tpu.pipeline_mode<synchronous>, transform_indices = @transform_3, window_bounds = array<i64: 4, 128>}, {pipeline_mode = #tpu.pipeline_mode<synchronous>, transform_indices = @transform_4, window_bounds = array<i64: 1, 128>}, {pipeline_mode = #tpu.pipeline_mode<synchronous>, transform_indices = @transform_5, window_bounds = array<i64: 128, 128>}, {pipeline_mode = #tpu.pipeline_mode<synchronous>, transform_indices = @transform_6, window_bounds = array<i64: 1, 128>}, {pipeline_mode = #tpu.pipeline_mode<synchronous>, transform_indices = @transform_7, window_bounds = array<i64: 128, 128>}, {pipeline_mode = #tpu.pipeline_mode<synchronous>, transform_indices = @transform_8, window_bounds = array<i64: 1, 128>}, {transform_indices = @transform_9, window_bounds = array<i64: 8, 128>}]} {
    %c0 = arith.constant 0 : index
    %c0_0 = arith.constant 0 : index
    %0 = vector.load %arg1[%c0, %c0_0] : memref<8x4xf32, #tpu.memory_space<vmem>>, vector<8x4xf32>
    %c0_1 = arith.constant 0 : index
    %c0_2 = arith.constant 0 : index
    %1 = vector.load %arg4[%c0_1, %c0_2] : memref<4x128xf32, #tpu.memory_space<vmem>>, vector<4x128xf32>
    %cst = arith.constant dense<0.000000e+00> : vector<8x128xf32>
    %2 = tpu.matmul %0, %1, %cst {dimension_numbers = #tpu.dot_dimension_numbers<[1], [0], [0], [1], [0, 0, 1, 1], [], []>} : vector<8x4xf32>, vector<4x128xf32>, vector<8x128xf32> -> vector<8x128xf32>
    %c0_3 = arith.constant 0 : index
    %c0_4 = arith.constant 0 : index
    %3 = vector.load %arg2[%c0_3, %c0_4] : memref<8x1xf32, #tpu.memory_space<vmem>>, vector<8x1xf32>
    %c0_5 = arith.constant 0 : index
    %c0_6 = arith.constant 0 : index
    %4 = vector.load %arg5[%c0_5, %c0_6] : memref<1x128xf32, #tpu.memory_space<vmem>>, vector<1x128xf32>
    %5 = vector.broadcast %3 : vector<8x1xf32> to vector<8x128xf32>
    %6 = vector.broadcast %4 : vector<1x128xf32> to vector<8x128xf32>
    %7 = arith.mulf %5, %6 : vector<8x128xf32>
    %8 = arith.addf %2, %7 : vector<8x128xf32>
    %c0_7 = arith.constant 0 : index
    %c0_8 = arith.constant 0 : index
    %9 = vector.load %arg3[%c0_7, %c0_8] : memref<8x128xf32, #tpu.memory_space<vmem>>, vector<8x128xf32>
    %c0_9 = arith.constant 0 : index
    %c0_10 = arith.constant 0 : index
    %10 = vector.load %arg6[%c0_9, %c0_10] : memref<128x128xf32, #tpu.memory_space<vmem>>, vector<128x128xf32>
    %cst_11 = arith.constant dense<0.000000e+00> : vector<8x128xf32>
    %11 = tpu.matmul %9, %10, %cst_11 {dimension_numbers = #tpu.dot_dimension_numbers<[1], [0], [0], [1], [0, 0, 1, 1], [], []>} : vector<8x128xf32>, vector<128x128xf32>, vector<8x128xf32> -> vector<8x128xf32>
    %12 = arith.addf %8, %11 : vector<8x128xf32>
    %c0_12 = arith.constant 0 : index
    %c0_13 = arith.constant 0 : index
    %13 = vector.load %arg7[%c0_12, %c0_13] : memref<1x128xf32, #tpu.memory_space<vmem>>, vector<1x128xf32>
    %14 = vector.broadcast %13 : vector<1x128xf32> to vector<8x128xf32>
    %15 = arith.addf %12, %14 : vector<8x128xf32>
    %16 = math.tanh %15 : vector<8x128xf32>
    %c0_14 = arith.constant 0 : index
    %c0_15 = arith.constant 0 : index
    %17 = vector.load %arg8[%c0_14, %c0_15] : memref<128x128xf32, #tpu.memory_space<vmem>>, vector<128x128xf32>
    %cst_16 = arith.constant dense<0.000000e+00> : vector<8x128xf32>
    %18 = tpu.matmul %16, %17, %cst_16 {dimension_numbers = #tpu.dot_dimension_numbers<[1], [0], [0], [1], [0, 0, 1, 1], [], []>} : vector<8x128xf32>, vector<128x128xf32>, vector<8x128xf32> -> vector<8x128xf32>
    %c0_17 = arith.constant 0 : index
    %c0_18 = arith.constant 0 : index
    %19 = vector.load %arg9[%c0_17, %c0_18] : memref<1x128xf32, #tpu.memory_space<vmem>>, vector<1x128xf32>
    %20 = vector.broadcast %19 : vector<1x128xf32> to vector<8x128xf32>
    %21 = arith.addf %18, %20 : vector<8x128xf32>
    %22 = math.tanh %21 : vector<8x128xf32>
    %c0_19 = arith.constant 0 : index
    %c0_20 = arith.constant 0 : index
    %23 = vector.load %arg10[%c0_19, %c0_20] : memref<8x128xf32, #tpu.memory_space<vmem>>, vector<8x128xf32>
    tpu.vector_store %arg10[%c0_19, %c0_20], %22 {strides = array<i32>} : memref<8x128xf32, #tpu.memory_space<vmem>>, vector<8x128xf32>,
    return
  }
  func.func @transform_0(%arg0: i32) -> (i32, i32) {
    %c0_i32 = arith.constant 0 : i32
    %c0_i32_0 = arith.constant 0 : i32
    return %arg0, %c0_i32 : i32, i32
  }
  func.func @transform_1(%arg0: i32) -> (i32, i32) {
    %c0_i32 = arith.constant 0 : i32
    %c0_i32_0 = arith.constant 0 : i32
    return %arg0, %c0_i32 : i32, i32
  }
  func.func @transform_2(%arg0: i32) -> (i32, i32) {
    %c0_i32 = arith.constant 0 : i32
    %c0_i32_0 = arith.constant 0 : i32
    return %arg0, %c0_i32 : i32, i32
  }
  func.func @transform_3(%arg0: i32) -> (i32, i32) {
    %c0_i32 = arith.constant 0 : i32
    %c0_i32_0 = arith.constant 0 : i32
    %c0_i32_1 = arith.constant 0 : i32
    return %c0_i32, %c0_i32_0 : i32, i32
  }
  func.func @transform_4(%arg0: i32) -> (i32, i32) {
    %c0_i32 = arith.constant 0 : i32
    %c0_i32_0 = arith.constant 0 : i32
    %c0_i32_1 = arith.constant 0 : i32
    return %c0_i32, %c0_i32_0 : i32, i32
  }
  func.func @transform_5(%arg0: i32) -> (i32, i32) {
    %c0_i32 = arith.constant 0 : i32
    %c0_i32_0 = arith.constant 0 : i32
    %c0_i32_1 = arith.constant 0 : i32
    return %c0_i32, %c0_i32_0 : i32, i32
  }
  func.func @transform_6(%arg0: i32) -> (i32, i32) {
    %c0_i32 = arith.constant 0 : i32
    %c0_i32_0 = arith.constant 0 : i32
    %c0_i32_1 = arith.constant 0 : i32
    return %c0_i32, %c0_i32_0 : i32, i32
  }
  func.func @transform_7(%arg0: i32) -> (i32, i32) {
    %c0_i32 = arith.constant 0 : i32
    %c0_i32_0 = arith.constant 0 : i32
    %c0_i32_1 = arith.constant 0 : i32
    return %c0_i32, %c0_i32_0 : i32, i32
  }
  func.func @transform_8(%arg0: i32) -> (i32, i32) {
    %c0_i32 = arith.constant 0 : i32
    %c0_i32_0 = arith.constant 0 : i32
    %c0_i32_1 = arith.constant 0 : i32
    return %c0_i32, %c0_i32_0 : i32, i32
  }
  func.func @transform_9(%arg0: i32) -> (i32, i32) {
    %c0_i32 = arith.constant 0 : i32
    %c0_i32_0 = arith.constant 0 : i32
    return %arg0, %c0_i32 : i32, i32
  }
}

</mosaic_0001>

<bundles_post_ra>
// kernel: tpu_custom_call.1
= control target key start
LH: loop header
LB: loop body
LE: loop exit
PB: predicated region body
PF: predicated region fallthrough
CT: control target
= control target key end

     0   :  { %14 = vsyncpa [#allocation3], 0  ;;  %s685_s0 = inlined_call_operand.vmem [shape: f32[8,4], index: 0, kind: input, shape index: {}]   ;;  %s686_s1 = inlined_call_operand.vmem [shape: f32[8,1], index: 1, kind: input, shape index: {}]   ;;  %s687_s2 = inlined_call_operand.vmem [shape: f32[8,128], index: 2, kind: input, shape index: {}]   ;;  %s688_s3 = inlined_call_operand.vmem [shape: f32[4,128], index: 3, kind: input, shape index: {}]   ;;  %s689_s4 = inlined_call_operand.vmem [shape: f32[1,128], index: 4, kind: input, shape index: {}]   ;;  %s690_s5 = inlined_call_operand.hbm [shape: f32[128,128], index: 5, kind: input, shape index: {}]   ;;  %s691_s6 = inlined_call_operand.vmem [shape: f32[1,128], index: 6, kind: input, shape index: {}]   ;;  %s692_s7 = inlined_call_operand.hbm [shape: f32[128,128], index: 7, kind: input, shape index: {}]   ;;  %s693_s8 = inlined_call_operand.vmem [shape: f32[1,128], index: 8, kind: input, shape index: {}]   ;;  %s694_s9 = inlined_call_operand.hbm [shape: f32[8,128], index: 9, kind: output, shape index: {}]  }
   0x1   :  { %15 = vsyncpa [#allocation6], 0 }
   0x2   :  { %16 = vsyncpa [#allocation4], 0  ;;  %s558_s30 = smov [#allocation2]  }
   0x3   :  { %s32_s10 = sshll.u32 %s558_s30, 4  ;;  %s33_s10 = int_to_ptr.vmem [resolvable:$true] %s32_s10 }
   0x4   :  { %s500_s11 = scalar_lea.vmem %s33_s10, 2048  ;;  %p505_p1 = scmp.lt.s32.totalorder %s33_s10, %s33_s10 }
   0x5   :  { %p501_p0 = scmp.ne.s32.totalorder %s33_s10, %s500_s11  ;;  %p506_p2 = scmp.lt.s32.totalorder %s500_s11, %s500_s11 }
   0x7   :  { %p507_p3 = por %p506_p2, %p505_p1 }
   0x9   :  { %p508_p4 = pnand %p507_p3, %p501_p0 }
   0xb   :  { %511 = shalt.err (!%p508_p4)
}
   0xc   :  { %s559_s12 = smov 128   ;;  %s560_s13 = smov 8  }
   0xd   :  { %38 = dma.hbm_to_vmem [thread:$0]  %s690_s5, 2048, %s33_s10, [#allocation3], %s559_s12, %s559_s12, %s560_s13  }
   0xe   :  { %s561_s16 = smov [#allocation5]  }
   0xf   :  { %s46_s17 = sshll.u32 %s561_s16, 4  ;;  %s47_s17 = int_to_ptr.vmem [resolvable:$true] %s46_s17 }
  0x10   :  { %s520_s18 = scalar_lea.vmem %s47_s17, 2048  ;;  %p525_p6 = scmp.lt.s32.totalorder %s47_s17, %s47_s17 }
  0x11   :  { %p521_p5 = scmp.ne.s32.totalorder %s47_s17, %s520_s18  ;;  %p526_p7 = scmp.lt.s32.totalorder %s520_s18, %s520_s18 }
  0x13   :  { %p527_p8 = por %p526_p7, %p525_p6 }
  0x15   :  { %p528_p9 = pnand %p527_p8, %p521_p5 }
  0x17   :  { %531 = shalt.err (!%p528_p9)
}
  0x18   :  { %52 = dma.hbm_to_vmem [thread:$0]  %s692_s7, 2048, %s47_s17, [#allocation6], %s559_s12, %s559_s12, %s560_s13  }
  0x19   :  { %552 = dma.done.wait [#allocation3], 2048  }
  0x1a   :  { %553 = vsyncadd [#allocation3], 4294965248 }
  0x1b   :  { %554 = dma.done.wait [#allocation6], 2048  }
  0x1c   :  { %555 = vsyncadd [#allocation6], 4294965248  ;;  %v562_v0 = vmov 0.0   ;;  %vm563_vm0 = vmmov 0   ;;  %v564_v1 = vmov 0   ;;  %v171_v2 = vld [vmem:[#allocation2 + $0x78] sm:$0xff] }
  0x1d   :  { %409 = vmatprep.subr.mxu1 %v562_v0  ;;  %404 = vmatprep.subr.mxu0 %v562_v0  ;;  %v170_v3 = vld [vmem:[#allocation2 + $0x70] sm:$0xff]  ;;  %v169_v4 = vld [vmem:[#allocation2 + $0x68] sm:$0xff]  ;;  %vm81_vm1 = vcmask 1043456   ;;  %vm77_vm2 = vcmask 31744   ;;  %v168_v5 = vld [vmem:[#allocation2 + $0x60] sm:$0xff] }
  0x1e   :  { %406 = vmatprep.mubr.msk.f32.mxu0 %vm563_vm0, %v562_v0  ;;  %441 = vmatprep.mubr.msk.f32.mxu1 %vm563_vm0, %v562_v0  ;;  %v62_v6 = vld [vmem:[%s688_s3] sm:$0xf]  ;;  %v167_v8 = vld [vmem:[#allocation2 + $0x58] sm:$0xff]  ;;  %v166_v11 = vld [vmem:[#allocation2 + $0x50] sm:$0xff] }
  0x1f   :  { %487 = vset.pattern.permute.xlu0 %v564_v1  ;;  %410 = vmatpush3.msra.mxu1 %v171_v2  ;;  %v61_v7 = vld [vmem:[%s685_s0] sm:$0xff]  ;;  %v267_v10 = vld [vmem:[#allocation5 + $0x78] sm:$0xff]  ;;  %v266_v12 = vld [vmem:[#allocation5 + $0x70] sm:$0xff] }
  0x20   :  { %411 = vmatprep.subr.mxu1 %v562_v0  ;;  %405 = vmatpush3.msk.msra.mxu0 %vm81_vm1, %v62_v6  ;;  %v63_v9 = vld [vmem:[%s686_s1] sm:$0xff]  ;;  %v165_v13 = vld [vmem:[#allocation2 + $0x48] sm:$0xff]  ;;  %v163_v17 = vld [vmem:[#allocation2 + $0x38] sm:$0xff] }
  0x21   :  { %412 = vmatpush3.msra.mxu1 %v170_v3  ;;  %407 = vmatmul.mubr.msk.f32.vlgmr.msra.gmra.mxu0 %vm77_vm2, %v61_v7  ;;  %v265_v14 = vld [vmem:[#allocation5 + $0x68] sm:$0xff]  ;;  %v164_v15 = vld [vmem:[#allocation2 + $0x40] sm:$0xff]  ;;  %v162_v18 = vld [vmem:[#allocation2 + $0x30] sm:$0xff] }
  0x22   :  { %413 = vmatprep.subr.mxu1 %v562_v0  ;;  %67 = vperm.xlu0 %487, %v63_v9   ;;  %v264_v16 = vld [vmem:[#allocation5 + $0x60] sm:$0xff]  ;;  %v161_v19 = vld [vmem:[#allocation2 + $0x28] sm:$0xff]  ;;  %v159_v21 = vld [vmem:[#allocation2 + $0x18] sm:$0xff] }
  0x23   :  { %414 = vmatpush3.msra.mxu1 %v169_v4  ;;  %444 = vmatprep.subr.mxu0 %v562_v0  ;;  %v160_v20 = vld [vmem:[#allocation2 + $0x20] sm:$0xff]  ;;  %v158_v22 = vld [vmem:[#allocation2 + $0x10] sm:$0xff]  ;;  %v157_v23 = vld [vmem:[#allocation2 + $0x8] sm:$0xff] }
  0x24   :  { %415 = vmatprep.subr.mxu1 %v562_v0  ;;  %445 = vmatpush3.msra.mxu0 %v267_v10  ;;  %v156_v24 = vld [vmem:[#allocation2] sm:$0xff]  ;;  %v263_v26 = vld [vmem:[#allocation5 + $0x58] sm:$0xff]  ;;  %v262_v27 = vld [vmem:[#allocation5 + $0x50] sm:$0xff] }
  0x25   :  { %416 = vmatpush3.msra.mxu1 %v168_v5  ;;  %446 = vmatprep.subr.mxu0 %v562_v0  ;;  %v155_v25 = vld [vmem:[%s687_s2] sm:$0xff]  ;;  %v261_v28 = vld [vmem:[#allocation5 + $0x48] sm:$0xff]  ;;  %v259_v30 = vld [vmem:[#allocation5 + $0x38] sm:$0xff] }
  0x26   :  { %417 = vmatprep.subr.mxu1 %v562_v0  ;;  %447 = vmatpush3.msra.mxu0 %v266_v12  ;;  %v260_v29 = vld [vmem:[#allocation5 + $0x40] sm:$0xff]  ;;  %v258_v31 = vld [vmem:[#allocation5 + $0x30] sm:$0xff]  ;;  %v257_v32 = vld [vmem:[#allocation5 + $0x28] sm:$0xff] }
  0x27   :  { %418 = vmatpush3.msra.mxu1 %v167_v8  ;;  %448 = vmatprep.subr.mxu0 %v562_v0  ;;  %v256_v33 = vld [vmem:[#allocation5 + $0x20] sm:$0xff]  ;;  %v255_v34 = vld [vmem:[#allocation5 + $0x18] sm:$0xff]  ;;  %v254_v35 = vld [vmem:[#allocation5 + $0x10] sm:$0xff] }
  0x28   :  { %419 = vmatprep.subr.mxu1 %v562_v0  ;;  %449 = vmatpush3.msra.mxu0 %v265_v14  ;;  %v253_v36 = vld [vmem:[#allocation5 + $0x8] sm:$0xff]  ;;  %v252_v37 = vld [vmem:[#allocation5] sm:$0xff] }
  0x29   :  { %420 = vmatpush3.msra.mxu1 %v166_v11  ;;  %450 = vmatprep.subr.mxu0 %v562_v0  ;;  %v363_v40 = vld [vmem:[%s689_s4] ss:$0 sm:$0xff]  ;;  %s565_s4 = smov [#allocation7]  }
  0x2a   :  { %421 = vmatprep.subr.mxu1 %v562_v0  ;;  %451 = vmatpush3.msra.mxu0 %v264_v16  ;;  %v366_v45 = vld [vmem:[%s691_s6] ss:$0 sm:$0xff]  ;;  %s353_s29 = sshll.u32 %s565_s4, 4  ;;  %s354_s29 = int_to_ptr.vmem [resolvable:$true] %s353_s29 }
  0x2b   :  { %422 = vmatpush3.msra.mxu1 %v165_v13  ;;  %452 = vmatprep.subr.mxu0 %v562_v0  ;;  %v367_v50 = vld [vmem:[%s693_s8] ss:$0 sm:$0xff]  ;;  %s532_s6 = scalar_lea.vmem %s354_s29, 128  ;;  %p537_p11 = scmp.lt.s32.totalorder %s354_s29, %s354_s29 }
  0x2c   :  { %423 = vmatprep.subr.mxu1 %v562_v0  ;;  %476 = vmatprep.mubr.msk.f32.mxu0 %vm563_vm0, %v562_v0  ;;  %p533_p10 = scmp.ne.s32.totalorder %s354_s29, %s532_s6  ;;  %p538_p12 = scmp.lt.s32.totalorder %s532_s6, %s532_s6 }
  0x2d   :  { %424 = vmatpush3.msra.mxu1 %v164_v15  ;;  %453 = vmatpush3.msra.mxu0 %v263_v26 }
  0x2e   :  { %425 = vmatprep.subr.mxu1 %v562_v0  ;;  %454 = vmatprep.subr.mxu0 %v562_v0  ;;  %p539_p13 = por %p538_p12, %p537_p11 }
  0x2f   :  { %426 = vmatpush3.msra.mxu1 %v163_v17  ;;  %455 = vmatpush3.msra.mxu0 %v262_v27 }
  0x30   :  { %427 = vmatprep.subr.mxu1 %v562_v0  ;;  %456 = vmatprep.subr.mxu0 %v562_v0  ;;  %p540_p0 = pnand %p539_p13, %p533_p10 }
  0x31   :  { %428 = vmatpush3.msra.mxu1 %v162_v18  ;;  %457 = vmatpush3.msra.mxu0 %v261_v28 }
  0x32   :  { %429 = vmatprep.subr.mxu1 %v562_v0  ;;  %458 = vmatprep.subr.mxu0 %v562_v0 }
  0x33   :  { %430 = vmatpush3.msra.mxu1 %v161_v19  ;;  %459 = vmatpush3.msra.mxu0 %v260_v29 }
  0x34   :  { %431 = vmatprep.subr.mxu1 %v562_v0  ;;  %460 = vmatprep.subr.mxu0 %v562_v0 }
  0x35   :  { %432 = vmatpush3.msra.mxu1 %v160_v20  ;;  %461 = vmatpush3.msra.mxu0 %v259_v30 }
  0x36   :  { %433 = vmatprep.subr.mxu1 %v562_v0  ;;  %462 = vmatprep.subr.mxu0 %v562_v0 }
  0x37   :  { %434 = vmatpush3.msra.mxu1 %v159_v21  ;;  %463 = vmatpush3.msra.mxu0 %v258_v31 }
  0x38   :  { %435 = vmatprep.subr.mxu1 %v562_v0  ;;  %464 = vmatprep.subr.mxu0 %v562_v0 }
  0x39   :  { %436 = vmatpush3.msra.mxu1 %v158_v22  ;;  %465 = vmatpush3.msra.mxu0 %v257_v32 }
  0x3a   :  { %437 = vmatprep.subr.mxu1 %v562_v0  ;;  %466 = vmatprep.subr.mxu0 %v562_v0 }
  0x3b   :  { %438 = vmatpush3.msra.mxu1 %v157_v23  ;;  %467 = vmatpush3.msra.mxu0 %v256_v33 }
  0x3c   :  { %439 = vmatprep.subr.mxu1 %v562_v0  ;;  %468 = vmatprep.subr.mxu0 %v562_v0 }
  0x3d   :  { %440 = vmatpush3.msra.mxu1 %v156_v24  ;;  %469 = vmatpush3.msra.mxu0 %v255_v34 }
  0x3e   :  { %442 = vmatmul.mubr.f32.vlgmr.msra.gmra.mxu1 %v155_v25  ;;  %470 = vmatprep.subr.mxu0 %v562_v0 }
  0x3f   :  { %471 = vmatpush3.msra.mxu0 %v254_v35 }
  0x40   :  { %472 = vmatprep.subr.mxu0 %v562_v0 }
  0x41   :  { %473 = vmatpush3.msra.mxu0 %v253_v36 }
  0x42   :  { %474 = vmatprep.subr.mxu0 %v562_v0 }
  0x43   :  { %475 = vmatpush3.msra.mxu0 %v252_v37 }
  0x9d   :  { %v68_v41 = vpop.permute.xlu0 %67 }
  0x9e   :  { %v76_v42 = vmul.f32 %v363_v40, %v68_v41 }
  0xe1   :  { %v151_v38 = vpop.f32.mrf.mxu0 }
  0xe2   :  { %v152_v43 = vadd.f32 %v151_v38, %v76_v42 }
  0xe3   :  { %v408_v39 = vpop.f32.mrf.mxu0 }
  0xfe   :  { %v238_v44 = vpop.f32.mrf.mxu1 }
  0xff   :  { %v242_v46 = vadd.f32 %v238_v44, %v152_v43 }
 0x100   :  { %v443_v47 = vpop.f32.mrf.mxu1 }
 0x101   :  { %v250_v48 = vadd.f32 %v366_v45, %v242_v46 }
 0x103   :  { %488 = vtanh.f32 %v250_v48 }
 0x110   :  { %v489_v49 = vpop.eup %488 }
 0x111   :  { %477 = vmatmul.mubr.f32.vlgmr.msra.gmra.mxu0 %v489_v49 }
 0x1d1   :  { %v341_v51 = vpop.f32.mrf.mxu0 }
 0x1d2   :  { %v342_v52 = vadd.f32 %v367_v50, %v341_v51 }
 0x1d3   :  { %v478_v53 = vpop.f32.mrf.mxu0 }
 0x1d4   :  { %490 = vtanh.f32 %v342_v52 }
 0x1e1   :  { %v491_v54 = vpop.eup %490 }
 0x1e2   :  { %346 = vst [vmem:[#allocation7] sm:$0xff] %v491_v54 }
 0x1e3   :  { %543 = shalt.err (!%p540_p0)
}
 0x1e4   :  { %356 = dma.vmem_to_hbm [thread:$0]  %s354_s29, 128, %s694_s9, [#allocation4]  }
 0x1e5   :  { %556 = dma.done.wait [#allocation4], 128  }
 0x1e6   :  { %557 = vsyncadd [#allocation4], 4294967168 }
 0x1e7   :  { %360 = vsyncpa [#allocation3], 1 }
 0x1e8   :  { %361 = vsyncpa [#allocation6], 1 }
 0x1e9   :  { %362 = vsyncpa [#allocation4], 1 }

</bundles_post_ra>
